<compile_context>
chip_gen: v7x
topology: tpu7x:2x2x1
jax: 0.10.0
libtpu: 0.0.40
codegen_flags: <defaults>
</compile_context>

<pallas_src>
import jax
import jax.numpy as jnp
from jax.experimental import pallas as pl
from jax.experimental.pallas import tpu as pltpu


def lossnet_kernel(w1_ref, b1_ref, w2_ref, b2_ref, x_ref, o_ref):
    # Block shapes (batch tile TB on the lane axis):
    #   w1_ref: (10, 2)  fc1.weight (PyTorch (out, in) layout), resident across grid
    #   b1_ref: (10, 1)  fc1.bias
    #   w2_ref: (10, 1)  fc2.weight as a column
    #   b2_ref: (1, 1)   fc2.bias
    #   x_ref : (2, TB)  input features x batch tile
    #   o_ref : (1, TB)  output, lane-dense
    x = x_ref[...].astype(jnp.float32)          # (2, TB)
    w1 = w1_ref[...]                            # (10, 2)
    b1 = b1_ref[...]                            # (10, 1)
    w2 = w2_ref[...]                            # (10, 1)
    b2 = b2_ref[...]                            # (1, 1)

    # fc1 + ReLU as VPU broadcast-FMAs (contraction K=2 is far too small for the MXU).
    h = w1[:, 0:1] * x[0:1, :] + w1[:, 1:2] * x[1:2, :] + b1      # (10, TB)
    h = jnp.maximum(h, 0.0)

    # fc2 + ReLU: per-sublane scale (VPU) then cross-sublane reduce (XLU) -> (1, TB).
    y = jnp.sum(w2 * h, axis=0, keepdims=True) + b2               # (1, TB)
    o_ref[...] = jnp.maximum(y, 0.0).astype(o_ref.dtype)


def lossnet_forward(x, w1, b1, w2, b2, *, tb=8192):
    """relu(fc2(relu(fc1(x)))).

    x : (B, 2)        input batch (row-major, PyTorch convention)
    w1: (10, 2)       fc1.weight (PyTorch (out, in))
    b1: (10,)         fc1.bias
    w2: (1, 10)       fc2.weight
    b2: (1,)          fc2.bias
    returns (B, 1) float32
    """
    B = x.shape[0]

    # Batch on the lane axis: (B, 2) -> (2, B), zero-padded to a multiple of the tile.
    b_pad = ((B + 127) // 128) * 128
    tb = min(tb, b_pad)
    b_pad = ((b_pad + tb - 1) // tb) * tb
    xt = jnp.zeros((2, b_pad), jnp.float32).at[:, :B].set(x.T.astype(jnp.float32))

    w1f = w1.astype(jnp.float32)                        # (10, 2)
    b1f = b1.reshape(10, 1).astype(jnp.float32)         # (10, 1)
    w2c = w2.reshape(1, 10).T.astype(jnp.float32)       # (10, 1)  column form
    b2f = b2.reshape(1, 1).astype(jnp.float32)          # (1, 1)

    grid = (b_pad // tb,)
    const = lambda i: (0, 0)     # parameters: same block every grid step (stay resident)

    flops = b_pad * (2 * 2 * 10 + 2 * 10 + 3 * 10 + 2)
    bytes_accessed = xt.size * 4 + b_pad * 4 + 4 * (w1f.size + b1f.size + w2c.size + b2f.size)

    out = pl.pallas_call(
        lossnet_kernel,
        out_shape=jax.ShapeDtypeStruct((1, b_pad), jnp.float32),
        grid=grid,
        in_specs=[
            pl.BlockSpec((10, 2), const),
            pl.BlockSpec((10, 1), const),
            pl.BlockSpec((10, 1), const),
            pl.BlockSpec((1, 1), const),
            pl.BlockSpec((2, tb), lambda i: (0, i)),
        ],
        out_specs=pl.BlockSpec((1, tb), lambda i: (0, i)),
        compiler_params=pltpu.CompilerParams(
            dimension_semantics=("parallel",),
        ),
        cost_estimate=pl.CostEstimate(
            flops=flops, transcendentals=0, bytes_accessed=bytes_accessed),
    )(w1f, b1f, w2c, b2f, xt)

    return out[:, :B].T          # back to PyTorch's (B, 1)


def init_params(key):
    # Deterministic init with PyTorch nn.Linear layouts: weight (out, in), bias (out,).
    k1, k2, k3, k4 = jax.random.split(key, 4)
    w1 = jax.random.uniform(k1, (10, 2), jnp.float32, -0.5, 0.5)   # fc1.weight
    b1 = jax.random.uniform(k2, (10,), jnp.float32, -0.5, 0.5)     # fc1.bias
    w2 = jax.random.uniform(k3, (1, 10), jnp.float32, -0.5, 0.5)   # fc2.weight
    b2 = jax.random.uniform(k4, (1,), jnp.float32, -0.5, 0.5)      # fc2.bias
    return w1, b1, w2, b2


def reference_forward(x, w1, b1, w2, b2):
    h = jnp.maximum(x @ w1.T + b1, 0.0)
    return jnp.maximum(h @ w2.T + b2, 0.0)


if __name__ == "__main__":
    key = jax.random.PRNGKey(0)
    kx, kp = jax.random.split(key)

    batch = 8
    x = jax.random.normal(kx, (batch, 2), jnp.float32)
    w1, b1, w2, b2 = init_params(kp)

    out = lossnet_forward(x, w1, b1, w2, b2)
    out = jax.block_until_ready(out)

    ref = reference_forward(x, w1, b1, w2, b2)
    assert out.shape == (batch, 1)
    assert jnp.allclose(out, ref, atol=1e-5, rtol=1e-5)

    print("KERNEL_OK")
</pallas_src>

<mosaic_0001>
module attributes {stable_mosaic.version = 11 : i64} {
  func.func @lossnet_kernel(%arg0: i32, %arg1: memref<10x2xf32, #tpu.memory_space<vmem>>, %arg2: memref<10x1xf32, #tpu.memory_space<vmem>>, %arg3: memref<10x1xf32, #tpu.memory_space<vmem>>, %arg4: memref<1x1xf32, #tpu.memory_space<vmem>>, %arg5: memref<2x128xf32, #tpu.memory_space<vmem>>, %arg6: memref<1x128xf32, #tpu.memory_space<vmem>>) attributes {dimension_semantics = [#tpu.dimension_semantics<parallel>], iteration_bounds = array<i64: 1>, scalar_prefetch = 0 : i64, scratch_operands = 0 : i64, tpu.core_type = #tpu.core_type<tc>, window_params = [{pipeline_mode = #tpu.pipeline_mode<synchronous>, transform_indices = @transform_0, window_bounds = array<i64: 10, 2>}, {pipeline_mode = #tpu.pipeline_mode<synchronous>, transform_indices = @transform_1, window_bounds = array<i64: 10, 1>}, {pipeline_mode = #tpu.pipeline_mode<synchronous>, transform_indices = @transform_2, window_bounds = array<i64: 10, 1>}, {pipeline_mode = #tpu.pipeline_mode<synchronous>, transform_indices = @transform_3, window_bounds = array<i64: 1, 1>}, {transform_indices = @transform_4, window_bounds = array<i64: 2, 128>}, {transform_indices = @transform_5, window_bounds = array<i64: 1, 128>}]} {
    %c0 = arith.constant 0 : index
    %c0_0 = arith.constant 0 : index
    %0 = vector.load %arg5[%c0, %c0_0] : memref<2x128xf32, #tpu.memory_space<vmem>>, vector<2x128xf32>
    %c0_1 = arith.constant 0 : index
    %c0_2 = arith.constant 0 : index
    %1 = vector.load %arg1[%c0_1, %c0_2] : memref<10x2xf32, #tpu.memory_space<vmem>>, vector<10x2xf32>
    %c0_3 = arith.constant 0 : index
    %c0_4 = arith.constant 0 : index
    %2 = vector.load %arg2[%c0_3, %c0_4] : memref<10x1xf32, #tpu.memory_space<vmem>>, vector<10x1xf32>
    %c0_5 = arith.constant 0 : index
    %c0_6 = arith.constant 0 : index
    %3 = vector.load %arg3[%c0_5, %c0_6] : memref<10x1xf32, #tpu.memory_space<vmem>>, vector<10x1xf32>
    %c0_7 = arith.constant 0 : index
    %c0_8 = arith.constant 0 : index
    %4 = vector.load %arg4[%c0_7, %c0_8] : memref<1x1xf32, #tpu.memory_space<vmem>>, vector<1x1xf32>
    %5 = vector.extract_strided_slice %1 {offsets = [0, 0], sizes = [10, 1], strides = [1, 1]} : vector<10x2xf32> to vector<10x1xf32>
    %6 = vector.extract_strided_slice %0 {offsets = [0, 0], sizes = [1, 128], strides = [1, 1]} : vector<2x128xf32> to vector<1x128xf32>
    %7 = vector.broadcast %5 : vector<10x1xf32> to vector<10x128xf32>
    %8 = vector.broadcast %6 : vector<1x128xf32> to vector<10x128xf32>
    %9 = arith.mulf %7, %8 : vector<10x128xf32>
    %10 = vector.extract_strided_slice %1 {offsets = [0, 1], sizes = [10, 1], strides = [1, 1]} : vector<10x2xf32> to vector<10x1xf32>
    %11 = vector.extract_strided_slice %0 {offsets = [1, 0], sizes = [1, 128], strides = [1, 1]} : vector<2x128xf32> to vector<1x128xf32>
    %12 = vector.broadcast %10 : vector<10x1xf32> to vector<10x128xf32>
    %13 = vector.broadcast %11 : vector<1x128xf32> to vector<10x128xf32>
    %14 = arith.mulf %12, %13 : vector<10x128xf32>
    %15 = arith.addf %9, %14 : vector<10x128xf32>
    %16 = vector.broadcast %2 : vector<10x1xf32> to vector<10x128xf32>
    %17 = arith.addf %15, %16 : vector<10x128xf32>
    %cst = arith.constant 0.000000e+00 : f32
    %18 = vector.broadcast %cst : f32 to vector<10x128xf32>
    %19 = arith.maximumf %17, %18 : vector<10x128xf32>
    %20 = vector.broadcast %3 : vector<10x1xf32> to vector<10x128xf32>
    %21 = arith.mulf %20, %19 : vector<10x128xf32>
    %cst_9 = arith.constant dense<0.000000e+00> : vector<128xf32>
    %22 = vector.multi_reduction <add>, %21, %cst_9 [0] : vector<10x128xf32> to vector<128xf32>
    %23 = vector.shape_cast %22 : vector<128xf32> to vector<1x128xf32>
    %24 = vector.broadcast %4 : vector<1x1xf32> to vector<1x128xf32>
    %25 = arith.addf %23, %24 : vector<1x128xf32>
    %cst_10 = arith.constant 0.000000e+00 : f32
    %26 = vector.broadcast %cst_10 : f32 to vector<1x128xf32>
    %27 = arith.maximumf %25, %26 : vector<1x128xf32>
    %c0_11 = arith.constant 0 : index
    %c0_12 = arith.constant 0 : index
    %28 = vector.load %arg6[%c0_11, %c0_12] : memref<1x128xf32, #tpu.memory_space<vmem>>, vector<1x128xf32>
    tpu.vector_store %arg6[%c0_11, %c0_12], %27 {strides = array<i32>} : memref<1x128xf32, #tpu.memory_space<vmem>>, vector<1x128xf32>,
    return
  }
  func.func @transform_0(%arg0: i32) -> (i32, i32) {
    %c0_i32 = arith.constant 0 : i32
    %c0_i32_0 = arith.constant 0 : i32
    %c0_i32_1 = arith.constant 0 : i32
    return %c0_i32, %c0_i32_0 : i32, i32
  }
  func.func @transform_1(%arg0: i32) -> (i32, i32) {
    %c0_i32 = arith.constant 0 : i32
    %c0_i32_0 = arith.constant 0 : i32
    %c0_i32_1 = arith.constant 0 : i32
    return %c0_i32, %c0_i32_0 : i32, i32
  }
  func.func @transform_2(%arg0: i32) -> (i32, i32) {
    %c0_i32 = arith.constant 0 : i32
    %c0_i32_0 = arith.constant 0 : i32
    %c0_i32_1 = arith.constant 0 : i32
    return %c0_i32, %c0_i32_0 : i32, i32
  }
  func.func @transform_3(%arg0: i32) -> (i32, i32) {
    %c0_i32 = arith.constant 0 : i32
    %c0_i32_0 = arith.constant 0 : i32
    %c0_i32_1 = arith.constant 0 : i32
    return %c0_i32, %c0_i32_0 : i32, i32
  }
  func.func @transform_4(%arg0: i32) -> (i32, i32) {
    %c0_i32 = arith.constant 0 : i32
    %c0_i32_0 = arith.constant 0 : i32
    return %c0_i32, %arg0 : i32, i32
  }
  func.func @transform_5(%arg0: i32) -> (i32, i32) {
    %c0_i32 = arith.constant 0 : i32
    %c0_i32_0 = arith.constant 0 : i32
    return %c0_i32, %arg0 : i32, i32
  }
}

</mosaic_0001>

<bundles_post_ra>
// kernel: tpu_custom_call.1
= control target key start
LH: loop header
LB: loop body
LE: loop exit
PB: predicated region body
PF: predicated region fallthrough
CT: control target
= control target key end

     0   :  { %s226_s0 = inlined_call_operand.vmem [shape: f32[10,2], index: 0, kind: input, shape index: {}]   ;;  %s227_s1 = inlined_call_operand.vmem [shape: f32[10,1], index: 1, kind: input, shape index: {}]   ;;  %s228_s2 = inlined_call_operand.vmem [shape: f32[10,1], index: 2, kind: input, shape index: {}]   ;;  %s229_s3 = inlined_call_operand.<no memory space> [shape: f32[1,1], index: 3, kind: input, shape index: {}]   ;;  %s230_s4 = inlined_call_operand.vmem [shape: f32[2,128], index: 4, kind: input, shape index: {}]   ;;  %s231_s5 = inlined_call_operand.hbm [shape: f32[1,128], index: 5, kind: output, shape index: {}]  }
   0x1   :  { %v10_v0 = vstv %s229_s3 }
   0x2   :  { %11 = vst [vmem:[#allocation2] sm:$0x1] %v10_v0 }
   0x3   :  { %v25_v1 = vld [vmem:[%s226_s0 + $0x8] sm:$0x3]  ;;  %v24_v2 = vld [vmem:[%s226_s0] sm:$0xff]  ;;  %v157_v3 = vmov 0  }
   0x4   :  { %129 = vset.pattern.permute.xlu1 %v157_v3  ;;  %127 = vset.pattern.permute.xlu0 %v157_v3 }
   0x5   :  { %38 = vperm.xlu0 %127, %v25_v1   ;;  %33 = vperm.xlu1 %129, %v24_v2  }
   0x6   :  { %12 = vsyncpa [#allocation4], 0  ;;  %v158_v4 = vmov 1   ;;  %v26_v5 = vld [vmem:[%s227_s1] sm:$0xff]  ;;  %v27_v6 = vld [vmem:[%s227_s1 + $0x8] sm:$0x3]  ;;  %v41_v10 = vlaneseq }
   0x7   :  { %v29_v8 = vld [vmem:[%s228_s2 + $0x8] sm:$0x3]  ;;  %v28_v9 = vld [vmem:[%s228_s2] sm:$0xff]  ;;  %vm89_vm0 = vcmask 1041408   ;;  %s159_s2 = smov [#allocation3]  }
   0x8   :  { %v42_v11 = vshrl.u32 %v41_v10, 7  ;;  %v23_v14 = vld [vmem:[%s230_s4] sm:$0x3]  ;;  %s116_s4 = sshll.u32 %s159_s2, 4  ;;  %s117_s4 = int_to_ptr.vmem [resolvable:$true] %s116_s4 }
   0x9   :  { %128 = vset.pattern.permute.xlu0 %v158_v4  ;;  %130 = vset.pattern.permute.xlu1 %v158_v4  ;;  %v30_v7 = vld [vmem:[#allocation2] sm:$0x1]  ;;  %s133_s6 = scalar_lea.vmem %s117_s4, 16  ;;  %s137_s7 = scalar_lea.vmem %s117_s4, 32 }
   0xa   :  { %52 = vperm.xlu0 %128, %v25_v1   ;;  %48 = vperm.xlu1 %130, %v24_v2   ;;  %v43_v12 = vsub.s32 0, %v42_v11  ;;  %v57_v13 = vsub.s32 1, %v42_v11  ;;  %p134_p0 = scmp.ne.s32.totalorder %s117_s4, %s133_s6  ;;  %p138_p1 = scmp.lt.s32.totalorder %s117_s4, %s117_s4 }
   0xb   :  { %p139_p2 = scmp.lt.s32.totalorder %s137_s7, %s133_s6 }
   0xc   :  { %v44_v17 = vrot.slane %v23_v14, %v43_v12  ;;  %v58_v18 = vrot.slane %v23_v14, %v57_v13 }
   0xd   :  { %p140_p3 = por %p139_p2, %p138_p1 }
   0xe   :  { %132 = vset.pattern.permute.xlu0 %v157_v3  ;;  %131 = vset.pattern.permute.xlu1 %v157_v3 }
   0xf   :  { %65 = vperm.xlu0 %132, %v26_v5   ;;  %70 = vperm.xlu1 %131, %v27_v6   ;;  %p141_p4 = pnand %p140_p3, %p134_p0 }
  0x13   :  { %100 = vperm.xlu0 %132, %v30_v7   ;;  %84 = vperm.xlu1 %131, %v29_v8  }
  0x17   :  { %79 = vperm.xlu1 %131, %v28_v9  }
  0x84   :  { %v34_v15 = vpop.permute.xlu1 %33  ;;  %v39_v16 = vpop.permute.xlu0 %38 }
  0x85   :  { %v46_v19 = vmul.f32 %v44_v17, %v39_v16  ;;  %v45_v24 = vmul.f32 %v44_v17, %v34_v15 }
  0x89   :  { %v53_v20 = vpop.permute.xlu0 %52  ;;  %v49_v21 = vpop.permute.xlu1 %48 }
  0x8a   :  { %v60_v22 = vmul.f32 %v58_v18, %v53_v20  ;;  %v59_v23 = vmul.f32 %v58_v18, %v49_v21 }
  0x8c   :  { %v62_v25 = vadd.f32 %v60_v22, %v46_v19  ;;  %v61_v26 = vadd.f32 %v59_v23, %v45_v24 }
  0x8e   :  { %v66_v27 = vpop.permute.xlu0 %65  ;;  %v71_v28 = vpop.permute.xlu1 %70 }
  0x8f   :  { %v74_v29 = vadd.f32 %v71_v28, %v62_v25  ;;  %v73_v30 = vadd.f32 %v66_v27, %v61_v26 }
  0x91   :  { %v76_v31 = vmax.f32 %v74_v29, 0.0  ;;  %v75_v34 = vmax.f32 %v73_v30, 0.0 }
  0x92   :  { %v85_v32 = vpop.permute.xlu1 %84  ;;  %v101_v43 = vpop.permute.xlu0 %100 }
  0x93   :  { %v88_v33 = vmul.f32 %v85_v32, %v76_v31  ;;  %v106_v45 = vrot.slane %v101_v43, %v43_v12 }
  0x95   :  { %v90_v37 = vsel %vm89_vm0, %v88_v33, 0.0 }
  0x96   :  { %v80_v35 = vpop.permute.xlu1 %79 }
  0x97   :  { %v87_v36 = vmul.f32 %v80_v35, %v75_v34 }
  0x99   :  { %v91_v38 = vadd.f32 %v90_v37, %v87_v36 }
  0x9b   :  { %v92_v39 = vrot.slane %v91_v38, 4 }
  0x9d   :  { %v93_v40 = vadd.f32 %v92_v39, %v91_v38 }
  0x9f   :  { %v94_v41 = vrot.slane %v93_v40, 2 }
  0xa1   :  { %v95_v42 = vadd.f32 %v94_v41, %v93_v40 }
  0xa3   :  { %v96_v44 = vrot.slane %v95_v42, 1 }
  0xa5   :  { %v97_v46 = vadd.f32 %v96_v44, %v95_v42 }
  0xa7   :  { %v107_v47 = vadd.f32 %v106_v45, %v97_v46 }
  0xa9   :  { %v108_v48 = vmax.f32 %v107_v47, 0.0 }
  0xab   :  { %109 = vst [vmem:[#allocation3] sm:$0x1] %v108_v48 }
  0xac   :  { %144 = shalt.err (!%p141_p4)
}
  0xad   :  { %s145_s10 = scalar_lea.hbm %s231_s5, 16 }
  0xae   :  { %p146_p5 = scmp.ne.s32.totalorder %s231_s5, %s145_s10  ;;  %p149_p6 = scmp.lt.u32.totalorder %s145_s10, %s231_s5 }
  0xb0   :  { %p151_p7 = pnand %p149_p6, %p146_p5 }
  0xb2   :  { %154 = shalt.err (!%p151_p7)
}
  0xb3   :  { %119 = dma.vmem_to_hbm [thread:$0]  %s117_s4, 16, %s231_s5, [#allocation4]  }
  0xb4   :  { %155 = dma.done.wait [#allocation4], 16  }
  0xb5   :  { %156 = vsyncadd [#allocation4], 4294967280 }
  0xb6   :  { %123 = vsyncpa [#allocation4], 1 }

</bundles_post_ra>
